<compile_context>
chip_gen: v7x
topology: tpu7x:2x2x1
jax: 0.10.0
libtpu: 0.0.40
codegen_flags: <defaults>
</compile_context>

<pallas_src>
import functools

import jax
import jax.numpy as jnp
from jax.experimental import pallas as pl
from jax.experimental.pallas import tpu as pltpu


def _conv1x1_kernel(x_ref, w_ref, b_ref, o_ref, *, compute_dtype):
    # x_ref: (1, C, thw)  input dtype (f32); cast to the MXU dtype in VMEM so
    #                     the wrapper never materializes a bf16 activation copy
    #                     in HBM (this kernel is HBM-bandwidth-bound).
    # w_ref: (Np, C)      compute dtype (bf16), resident across the grid
    # b_ref: (Np, 1)      f32, resident across the grid
    # o_ref: (1, Np, thw) output dtype (lane-dense: thw is a multiple of 128)
    xt = x_ref[0].astype(compute_dtype)
    acc = jnp.dot(w_ref[...], xt, preferred_element_type=jnp.float32)
    o_ref[0] = (acc + b_ref[...]).astype(o_ref.dtype)


def conv1x1_nchw(x, weight, bias, *, lane_tile=2048, compute_dtype=jnp.bfloat16):
    """1x1 Conv2d over NCHW input, same semantics as torch.nn.Conv2d(k=1).

    out[b, n, h, w] = sum_k weight[n, k, 0, 0] * x[b, k, h, w] + bias[n]

    Computed directly in NCHW layout (no transposes): for each batch element
    and each HW lane-tile, a single MXU matmul W[Np, K] @ X[K, thw].
    """
    B, C, H, W = x.shape
    N_out, C_in, kh, kw = weight.shape
    assert (C_in, kh, kw) == (C, 1, 1), "expects a 1x1 conv with matching Cin"
    assert C % 8 == 0, "in_channels must be a multiple of 8 (sublane)"

    out_dtype = x.dtype
    HW = H * W

    # Sublane-pad out-channels to a multiple of 8; padded rows are zeros and
    # are sliced off after the call (only when padding was actually needed).
    Np = max(8, ((N_out + 7) // 8) * 8)

    # ---- lane-tile selection ------------------------------------------------
    HW128 = pl.cdiv(HW, 128) * 128                     # lane-rounded HW
    thw = max(128, (min(lane_tile, HW128) // 128) * 128)

    # v7x has 2 TensorCores per chip: with a single batch element make sure the
    # HW axis contributes >= 2 parallel programs (free on v5e/v6e: 1 TC).
    if B == 1:
        while thw > 128 and pl.cdiv(HW128, thw) < 2:
            thw = max(128, ((thw // 2) // 128) * 128)

    # VMEM budget: 3 input buffers (f32) + 2 output buffers + resident W/b.
    # Keep it well under v7x's 64 MiB physical VMEM (v5e/v6e have 128 MiB).
    def _vmem_bytes(t):
        return (3 * C * t * x.dtype.itemsize
                + 2 * Np * t * jnp.dtype(out_dtype).itemsize
                + 2 * (Np * C * jnp.dtype(compute_dtype).itemsize + Np * 4))

    while thw > 128 and _vmem_bytes(thw) > 44 * 1024 * 1024:
        thw = max(128, ((thw // 2) // 128) * 128)

    HW_pad = pl.cdiv(HW, thw) * thw
    n_hw_tiles = HW_pad // thw
    n_steps = B * n_hw_tiles
    buf_count = 3 if n_steps >= 3 else 2               # Buffered(2) == default

    # ---- layout glue: reshape (+ zero-pad only when needed), no transposes --
    x3 = x.reshape(B, C, HW)
    if HW_pad != HW:
        x3 = jnp.pad(x3, ((0, 0), (0, 0), (0, HW_pad - HW)))

    w2 = weight.reshape(N_out, C)
    if Np != N_out:
        w2 = jnp.pad(w2, ((0, Np - N_out), (0, 0)))
    w2 = w2.astype(compute_dtype)

    b2 = bias.astype(jnp.float32).reshape(N_out, 1)
    if Np != N_out:
        b2 = jnp.pad(b2, ((0, Np - N_out), (0, 0)))

    grid = (B, n_hw_tiles)

    bytes_accessed = (
        x3.size * x3.dtype.itemsize
        + w2.size * w2.dtype.itemsize
        + b2.size * 4
        + B * Np * HW_pad * jnp.dtype(out_dtype).itemsize
    )
    vmem_limit = int(min(max(_vmem_bytes(thw) + (2 << 20), 16 << 20), 48 << 20))

    kernel = functools.partial(_conv1x1_kernel, compute_dtype=compute_dtype)

    out3 = pl.pallas_call(
        kernel,
        out_shape=jax.ShapeDtypeStruct((B, Np, HW_pad), out_dtype),
        grid_spec=pl.GridSpec(
            grid=grid,
            in_specs=[
                # activations: one batch element, all channels, one HW tile;
                # 3-deep buffering keeps the (DMA-only) pipeline's HBM queue full
                pl.BlockSpec((1, C, thw), lambda b, j: (b, 0, j),
                             pipeline_mode=pl.Buffered(buf_count)),
                # full (padded) weight, resident for the whole grid
                pl.BlockSpec((Np, C), lambda b, j: (0, 0)),
                # bias column, resident
                pl.BlockSpec((Np, 1), lambda b, j: (0, 0)),
            ],
            out_specs=pl.BlockSpec((1, Np, thw), lambda b, j: (b, 0, j)),
        ),
        compiler_params=pltpu.CompilerParams(
            dimension_semantics=("parallel", "parallel"),
            # derived from the actual buffer plan; explicit so v5e's 16 MiB
            # scoped default doesn't reject larger tiles and v7x's 64 MiB
            # physical VMEM is never overshot.
            vmem_limit_bytes=vmem_limit,
        ),
        cost_estimate=pl.CostEstimate(
            flops=2 * B * Np * C * HW_pad,
            transcendentals=0,
            bytes_accessed=bytes_accessed,
        ),
    )(x3, w2, b2)

    # Drop channel / spatial padding only if any was added; no transpose needed.
    if Np == N_out and HW_pad == HW:
        return out3.reshape(B, N_out, H, W)
    return out3[:, :N_out, :HW].reshape(B, N_out, H, W)


class PointRCNN:
    """JAX/Pallas port of the classifier head of the PyTorch PointRCNN module.

    TODO(synk): the config-driven pcdet backbone (cfg_from_yaml_file +
    build_network) has no self-contained Pallas equivalent; only the
    classifier head Conv2d(512, out_channels, kernel_size=1) is implemented.
    The torch forward() body is `pass`; we expose the classifier head.
    """

    CLS_IN = 512  # hardcoded in the torch module's classifier

    def __init__(self, in_channels, out_channels, key):
        del in_channels  # the torch classifier head ignores it too (hardcoded 512)
        self.out_channels = out_channels
        # Deterministic init mimicking torch.nn.Conv2d default:
        # U(-1/sqrt(fan_in), 1/sqrt(fan_in)) with fan_in = 512*1*1.
        kw_, kb_ = jax.random.split(key)
        bound = 1.0 / jnp.sqrt(float(self.CLS_IN))
        self.weight = jax.random.uniform(
            kw_, (out_channels, self.CLS_IN, 1, 1),
            minval=-bound, maxval=bound, dtype=jnp.float32)
        self.bias = jax.random.uniform(
            kb_, (out_channels,),
            minval=-bound, maxval=bound, dtype=jnp.float32)

    def __call__(self, x):
        return conv1x1_nchw(x, self.weight, self.bias)


if __name__ == "__main__":
    key = jax.random.PRNGKey(0)
    k_params, k_x = jax.random.split(key)

    # 512 input channels are hardcoded by the torch classifier head.
    # H=W=16 keeps it small while giving HW=256 (>=128 lanes) and a grid of
    # 2 programs so both v7x TensorCores get work.
    B, C, H, W = 2, 512, 16, 16
    OUT_CHANNELS = 16

    x = jax.random.normal(k_x, (B, C, H, W), dtype=jnp.float32)
    model = PointRCNN(in_channels=C, out_channels=OUT_CHANNELS, key=k_params)

    fwd = jax.jit(lambda inp: model(inp))
    y = jax.block_until_ready(fwd(x))

    # Correctness check vs plain-JAX f32 reference of the 1x1 conv.
    # The kernel uses bf16 operands with f32 accumulation -> relaxed tolerance.
    ref = jnp.einsum("bchw,oc->bohw", x, model.weight.reshape(OUT_CHANNELS, C))
    ref = ref + model.bias.reshape(1, OUT_CHANNELS, 1, 1)
    assert y.shape == (B, OUT_CHANNELS, H, W)
    max_err = float(jnp.max(jnp.abs(y - ref)))
    assert jnp.allclose(y, ref, atol=5e-2, rtol=5e-2), (
        "max abs err = %f" % max_err)

    print("KERNEL_OK")
</pallas_src>

<mosaic_0001>
module attributes {stable_mosaic.version = 11 : i64} {
  func.func @_conv1x1_kernel(%arg0: i32, %arg1: i32, %arg2: memref<1x512x256xf32, #tpu.memory_space<vmem>>, %arg3: memref<16x512xbf16, #tpu.memory_space<vmem>>, %arg4: memref<16x1xf32, #tpu.memory_space<vmem>>, %arg5: memref<1x16x256xf32, #tpu.memory_space<vmem>>) attributes {dimension_semantics = [#tpu.dimension_semantics<parallel>, #tpu.dimension_semantics<parallel>], iteration_bounds = array<i64: 2, 1>, scalar_prefetch = 0 : i64, scratch_operands = 0 : i64, tpu.core_type = #tpu.core_type<tc>, window_params = [{pipeline_mode = #tpu.pipeline_mode<double_buffered>, transform_indices = @transform_0, window_bounds = array<i64: 1, 512, 256>}, {pipeline_mode = #tpu.pipeline_mode<synchronous>, transform_indices = @transform_1, window_bounds = array<i64: 16, 512>}, {pipeline_mode = #tpu.pipeline_mode<synchronous>, transform_indices = @transform_2, window_bounds = array<i64: 16, 1>}, {transform_indices = @transform_3, window_bounds = array<i64: 1, 16, 256>}]} {
    %c0 = arith.constant 0 : index
    %c0_0 = arith.constant 0 : index
    %c0_1 = arith.constant 0 : index
    %0 = vector.load %arg2[%c0, %c0_0, %c0_1] : memref<1x512x256xf32, #tpu.memory_space<vmem>>, vector<1x512x256xf32>
    %1 = vector.shape_cast %0 : vector<1x512x256xf32> to vector<512x256xf32>
    %2 = arith.truncf %1 : vector<512x256xf32> to vector<512x256xbf16>
    %c0_2 = arith.constant 0 : index
    %c0_3 = arith.constant 0 : index
    %3 = vector.load %arg3[%c0_2, %c0_3] : memref<16x512xbf16, #tpu.memory_space<vmem>>, vector<16x512xbf16>
    %cst = arith.constant dense<0.000000e+00> : vector<16x256xf32>
    %4 = tpu.matmul %3, %2, %cst {dimension_numbers = #tpu.dot_dimension_numbers<[1], [0], [0], [1], [0, 0, 1, 1], [], []>} : vector<16x512xbf16>, vector<512x256xbf16>, vector<16x256xf32> -> vector<16x256xf32>
    %c0_4 = arith.constant 0 : index
    %c0_5 = arith.constant 0 : index
    %5 = vector.load %arg4[%c0_4, %c0_5] : memref<16x1xf32, #tpu.memory_space<vmem>>, vector<16x1xf32>
    %6 = vector.broadcast %5 : vector<16x1xf32> to vector<16x256xf32>
    %7 = arith.addf %4, %6 : vector<16x256xf32>
    %c0_6 = arith.constant 0 : index
    %c0_7 = arith.constant 0 : index
    %c0_8 = arith.constant 0 : index
    %8 = vector.load %arg5[%c0_6, %c0_7, %c0_8] : memref<1x16x256xf32, #tpu.memory_space<vmem>>, vector<1x16x256xf32>
    %9 = vector.shape_cast %8 : vector<1x16x256xf32> to vector<16x256xf32>
    %10 = vector.shape_cast %7 : vector<16x256xf32> to vector<1x16x256xf32>
    tpu.vector_store %arg5[%c0_6, %c0_7, %c0_8], %10 {strides = array<i32>} : memref<1x16x256xf32, #tpu.memory_space<vmem>>, vector<1x16x256xf32>,
    return
  }
  func.func @transform_0(%arg0: i32, %arg1: i32) -> (i32, i32, i32) {
    %c0_i32 = arith.constant 0 : i32
    %c0_i32_0 = arith.constant 0 : i32
    return %arg0, %c0_i32, %arg1 : i32, i32, i32
  }
  func.func @transform_1(%arg0: i32, %arg1: i32) -> (i32, i32) {
    %c0_i32 = arith.constant 0 : i32
    %c0_i32_0 = arith.constant 0 : i32
    %c0_i32_1 = arith.constant 0 : i32
    return %c0_i32, %c0_i32_0 : i32, i32
  }
  func.func @transform_2(%arg0: i32, %arg1: i32) -> (i32, i32) {
    %c0_i32 = arith.constant 0 : i32
    %c0_i32_0 = arith.constant 0 : i32
    %c0_i32_1 = arith.constant 0 : i32
    return %c0_i32, %c0_i32_0 : i32, i32
  }
  func.func @transform_3(%arg0: i32, %arg1: i32) -> (i32, i32, i32) {
    %c0_i32 = arith.constant 0 : i32
    %c0_i32_0 = arith.constant 0 : i32
    return %arg0, %c0_i32, %arg1 : i32, i32, i32
  }
}

</mosaic_0001>

<bundles_post_ra>
// kernel: _lambda_.1
= control target key start
LH: loop header
LB: loop body
LE: loop exit
PB: predicated region body
PF: predicated region fallthrough
CT: control target
= control target key end

     0   :  { %s717_s12 = smov 0   ;;  %s719_s13 = smov 0   ;;  %s902_s0 = inlined_call_operand.vmem [shape: f32[2,512,256], index: 0, kind: input, shape index: {}]   ;;  %s903_s1 = inlined_call_operand.vmem [shape: bf16[16,512], index: 1, kind: input, shape index: {}]   ;;  %s904_s2 = inlined_call_operand.vmem [shape: f32[16,1], index: 2, kind: input, shape index: {}]   ;;  %s905_s3 = inlined_call_operand.vmem [shape: f32[2,16,256], index: 3, kind: output, shape index: {}]  }
   0x1   :  { %s721_s14 = smov 0  }
   0x2 LB: > { %s25_s15 = sadd.s32 1, %s690_s13  ;;  %p619_p0 = scmp.ge.s32.totalorder %s694_s14, 1  ;;  %s694_s14 = sphi %s721_s14, %s13_s14   ;;  %s690_s13 = sphi %s719_s13, %s907_s13   ;;  %s686_s12 = sphi %s717_s12, %s906_s12  }
   0x3   : > { %p27_p1 = scmp.ge.s32.totalorder %s25_s15, 2  ;;  %p158_p2 = scmp.lt.s32.totalorder %s694_s14, 3 }
   0x5   : > { %s909_s15 = smov (%p27_p1, %s25_s15), 0  ;;  %p159_p3 = pnand %p619_p0, %p158_p2 }
   0x6   : > { %p191_p4 = scmp.lt.s32.totalorder (!%p159_p3), %s686_s12, 1  ;;  %v668_v0 = vld [vmem:[%s903_s1 + $0x4] ss:$16 sps:$4 sm:$0xff] (!%p159_p3)   ;;  %v696_v1 = vmov (!%p159_p3), 0   ;;  %v671_v2 = vld [vmem:[%s903_s1 + $0xc] ss:$16 sps:$4 sm:$0xff] (!%p159_p3)  }
   0x7   : > { %162 = sbr.rel (%p159_p3) target bundleno = 304 (0x130), region = 32  ;;  %665 = vset.pattern.permute.xlu0 (!%p159_p3), %v696_v1  ;;  %v406_v3 = vld [vmem:[%s904_s2] sm:$0xff] (!%p159_p3)  ;;  %470 = vmatprep.mubr.bf16.mxu1 (!%p159_p3), %v668_v0  ;;  %v407_v4 = vld [vmem:[%s904_s2 + $0x8] sm:$0xff] (!%p159_p3) }
   0x8   : > { %410 = vperm.xlu0 (!%p159_p3), %665, %v406_v3   ;;  %513 = vmatprep.mubr.bf16.mxu0 (!%p159_p3), %v671_v2 }
   0xc   : > { %415 = vperm.xlu0 (!%p159_p3), %665, %v407_v4  }
   0xe   : > { %s911_s12 = smov (!%p191_p4, %s686_s12), 1 }
   0xf   : > { %s630_s22 = sshll.u32 %s911_s12, 10  ;;  %s631_s5 = sshll.u32 %s911_s12, 5 }
  0x10   : > { %s753_s27 = scalar_lea.vmem %s902_s0, %s630_s22  ;;  %s208_s8 = scalar_lea.vmem %s905_s3, %s631_s5 }
  0x11   : > { %v211_v5 = vld [vmem:[%s753_s27 + $0x8] sm:$0xff]  ;;  %v213_v6 = vld [vmem:[%s753_s27 + $0x18] sm:$0xff]  ;;  %v210_v10 = vld [vmem:[%s753_s27] sm:$0xff] }
  0x12   : > { %v275_v7 = vld [vmem:[%s753_s27 + $0x208] sm:$0xff]  ;;  %v339_v8 = vpack.c.bf16 %v213_v6, %v211_v5  ;;  %v277_v9 = vld [vmem:[%s753_s27 + $0x218] sm:$0xff]  ;;  %v212_v11 = vld [vmem:[%s753_s27 + $0x10] sm:$0xff] }
  0x13   : > { %v371_v12 = vpack.c.bf16 %v277_v9, %v275_v7  ;;  %v338_v13 = vpack.c.bf16 %v212_v11, %v210_v10  ;;  %v274_v14 = vld [vmem:[%s753_s27 + $0x200] sm:$0xff]  ;;  %v276_v15 = vld [vmem:[%s753_s27 + $0x210] sm:$0xff]  ;;  %v215_v16 = vld [vmem:[%s753_s27 + $0x28] sm:$0xff] }
  0x14   : > { %438 = vmatprep.subr.bf16.mxu1 %v339_v8  ;;  %v370_v17 = vpack.c.bf16 %v276_v15, %v274_v14  ;;  %v217_v18 = vld [vmem:[%s753_s27 + $0x38] sm:$0xff]  ;;  %v279_v19 = vld [vmem:[%s753_s27 + $0x228] sm:$0xff]  ;;  %v214_v23 = vld [vmem:[%s753_s27 + $0x20] sm:$0xff] }
  0x15   : > { %v281_v20 = vld [vmem:[%s753_s27 + $0x238] sm:$0xff]  ;;  %481 = vmatprep.subr.bf16.mxu0 %v371_v12  ;;  %439 = vmatpush1.bf16.msra.mxu1 %v338_v13  ;;  %v341_v21 = vpack.c.bf16 %v217_v18, %v215_v16  ;;  %v216_v24 = vld [vmem:[%s753_s27 + $0x30] sm:$0xff]  ;;  %v278_v25 = vld [vmem:[%s753_s27 + $0x220] sm:$0xff] }
  0x16   : > { %v373_v22 = vpack.c.bf16 %v281_v20, %v279_v19  ;;  %482 = vmatpush1.bf16.msra.mxu0 %v370_v17  ;;  %v340_v26 = vpack.c.bf16 %v216_v24, %v214_v23  ;;  %v280_v27 = vld [vmem:[%s753_s27 + $0x230] sm:$0xff]  ;;  %v219_v28 = vld [vmem:[%s753_s27 + $0x48] sm:$0xff]  ;;  %v221_v29 = vld [vmem:[%s753_s27 + $0x58] sm:$0xff] }
  0x17   : > { %440 = vmatprep.subr.bf16.mxu1 %v341_v21  ;;  %v372_v30 = vpack.c.bf16 %v280_v27, %v278_v25  ;;  %v343_v31 = vpack.c.bf16 %v221_v29, %v219_v28  ;;  %v283_v32 = vld [vmem:[%s753_s27 + $0x248] sm:$0xff]  ;;  %v285_v33 = vld [vmem:[%s753_s27 + $0x258] sm:$0xff]  ;;  %v218_v34 = vld [vmem:[%s753_s27 + $0x40] sm:$0xff] }
  0x18   : > { %483 = vmatprep.subr.bf16.mxu0 %v373_v22  ;;  %v375_v35 = vpack.c.bf16 %v285_v33, %v283_v32  ;;  %v220_v36 = vld [vmem:[%s753_s27 + $0x50] sm:$0xff]  ;;  %v282_v37 = vld [vmem:[%s753_s27 + $0x240] sm:$0xff]  ;;  %v223_v40 = vld [vmem:[%s753_s27 + $0x68] sm:$0xff] }
  0x19   : > { %v284_v38 = vld [vmem:[%s753_s27 + $0x250] sm:$0xff]  ;;  %441 = vmatpush1.bf16.msra.mxu1 %v340_v26  ;;  %v342_v39 = vpack.c.bf16 %v220_v36, %v218_v34  ;;  %v225_v41 = vld [vmem:[%s753_s27 + $0x78] sm:$0xff]  ;;  %v287_v42 = vld [vmem:[%s753_s27 + $0x268] sm:$0xff] }
  0x1a   : > { %484 = vmatpush1.bf16.msra.mxu0 %v372_v30  ;;  %442 = vmatprep.subr.bf16.mxu1 %v343_v31  ;;  %v374_v43 = vpack.c.bf16 %v284_v38, %v282_v37  ;;  %v345_v44 = vpack.c.bf16 %v225_v41, %v223_v40  ;;  %v289_v45 = vld [vmem:[%s753_s27 + $0x278] sm:$0xff]  ;;  %v222_v46 = vld [vmem:[%s753_s27 + $0x60] sm:$0xff]  ;;  %v224_v47 = vld [vmem:[%s753_s27 + $0x70] sm:$0xff] }
  0x1b   : > { %485 = vmatprep.subr.bf16.mxu0 %v375_v35  ;;  %v377_v48 = vpack.c.bf16 %v289_v45, %v287_v42  ;;  %v286_v49 = vld [vmem:[%s753_s27 + $0x260] sm:$0xff]  ;;  %v288_v50 = vld [vmem:[%s753_s27 + $0x270] sm:$0xff]  ;;  %v227_v51 = vld [vmem:[%s753_s27 + $0x88] sm:$0xff]  ;;  %v344_v55 = vpack.c.bf16 %v224_v47, %v222_v46 }
  0x1c   : > { %v229_v52 = vld [vmem:[%s753_s27 + $0x98] sm:$0xff]  ;;  %v291_v53 = vld [vmem:[%s753_s27 + $0x288] sm:$0xff]  ;;  %v376_v56 = vpack.c.bf16 %v288_v50, %v286_v49  ;;  %v226_v58 = vld [vmem:[%s753_s27 + $0x80] sm:$0xff] }
  0x1d   : > { %v293_v54 = vld [vmem:[%s753_s27 + $0x298] sm:$0xff]  ;;  %443 = vmatpush1.bf16.msra.mxu1 %v342_v39  ;;  %v347_v57 = vpack.c.bf16 %v229_v52, %v227_v51  ;;  %v228_v59 = vld [vmem:[%s753_s27 + $0x90] sm:$0xff]  ;;  %v290_v60 = vld [vmem:[%s753_s27 + $0x280] sm:$0xff] }
  0x1e   : > { %486 = vmatpush1.bf16.msra.mxu0 %v374_v43  ;;  %444 = vmatprep.subr.bf16.mxu1 %v345_v44  ;;  %v379_v61 = vpack.c.bf16 %v293_v54, %v291_v53  ;;  %v292_v62 = vld [vmem:[%s753_s27 + $0x290] sm:$0xff]  ;;  %v231_v63 = vld [vmem:[%s753_s27 + $0xa8] sm:$0xff]  ;;  %v233_v0 = vld [vmem:[%s753_s27 + $0xb8] sm:$0xff]  ;;  %v346_v3 = vpack.c.bf16 %v228_v59, %v226_v58 }
  0x1f   : > { %487 = vmatprep.subr.bf16.mxu0 %v377_v48  ;;  %v295_v1 = vld [vmem:[%s753_s27 + $0x2a8] sm:$0xff]  ;;  %v297_v2 = vld [vmem:[%s753_s27 + $0x2b8] sm:$0xff]  ;;  %v378_v4 = vpack.c.bf16 %v292_v62, %v290_v60  ;;  %v349_v5 = vpack.c.bf16 %v233_v0, %v231_v63  ;;  %v230_v6 = vld [vmem:[%s753_s27 + $0xa0] sm:$0xff] }
  0x20   : > { %v232_v7 = vld [vmem:[%s753_s27 + $0xb0] sm:$0xff]  ;;  %v294_v8 = vld [vmem:[%s753_s27 + $0x2a0] sm:$0xff]  ;;  %v381_v9 = vpack.c.bf16 %v297_v2, %v295_v1  ;;  %v235_v11 = vld [vmem:[%s753_s27 + $0xc8] sm:$0xff] }
  0x21   : > { %445 = vmatpush1.bf16.msra.mxu1 %v344_v55  ;;  %v296_v10 = vld [vmem:[%s753_s27 + $0x2b0] sm:$0xff]  ;;  %v237_v12 = vld [vmem:[%s753_s27 + $0xd8] sm:$0xff]  ;;  %v299_v13 = vld [vmem:[%s753_s27 + $0x2c8] sm:$0xff]  ;;  %v348_v15 = vpack.c.bf16 %v232_v7, %v230_v6 }
  0x22   : > { %488 = vmatpush1.bf16.msra.mxu0 %v376_v56  ;;  %446 = vmatprep.subr.bf16.mxu1 %v347_v57  ;;  %v301_v14 = vld [vmem:[%s753_s27 + $0x2d8] sm:$0xff]  ;;  %v380_v16 = vpack.c.bf16 %v296_v10, %v294_v8  ;;  %v351_v17 = vpack.c.bf16 %v237_v12, %v235_v11  ;;  %v234_v18 = vld [vmem:[%s753_s27 + $0xc0] sm:$0xff]  ;;  %v236_v19 = vld [vmem:[%s753_s27 + $0xd0] sm:$0xff] }
  0x23   : > { %489 = vmatprep.subr.bf16.mxu0 %v379_v61  ;;  %v298_v20 = vld [vmem:[%s753_s27 + $0x2c0] sm:$0xff]  ;;  %v383_v21 = vpack.c.bf16 %v301_v14, %v299_v13  ;;  %v300_v22 = vld [vmem:[%s753_s27 + $0x2d0] sm:$0xff]  ;;  %v239_v23 = vld [vmem:[%s753_s27 + $0xe8] sm:$0xff]  ;;  %v350_v27 = vpack.c.bf16 %v236_v19, %v234_v18 }
  0x24   : > { %v241_v24 = vld [vmem:[%s753_s27 + $0xf8] sm:$0xff]  ;;  %v303_v25 = vld [vmem:[%s753_s27 + $0x2e8] sm:$0xff]  ;;  %v382_v28 = vpack.c.bf16 %v300_v22, %v298_v20  ;;  %v238_v30 = vld [vmem:[%s753_s27 + $0xe0] sm:$0xff] }
  0x25   : > { %447 = vmatpush1.bf16.msra.mxu1 %v346_v3  ;;  %v305_v26 = vld [vmem:[%s753_s27 + $0x2f8] sm:$0xff]  ;;  %v353_v29 = vpack.c.bf16 %v241_v24, %v239_v23  ;;  %v240_v31 = vld [vmem:[%s753_s27 + $0xf0] sm:$0xff]  ;;  %v302_v32 = vld [vmem:[%s753_s27 + $0x2e0] sm:$0xff] }
  0x26   : > { %490 = vmatpush1.bf16.msra.mxu0 %v378_v4  ;;  %448 = vmatprep.subr.bf16.mxu1 %v349_v5  ;;  %v385_v33 = vpack.c.bf16 %v305_v26, %v303_v25  ;;  %v304_v34 = vld [vmem:[%s753_s27 + $0x2f0] sm:$0xff]  ;;  %v243_v35 = vld [vmem:[%s753_s27 + $0x108] sm:$0xff]  ;;  %v245_v36 = vld [vmem:[%s753_s27 + $0x118] sm:$0xff]  ;;  %v352_v39 = vpack.c.bf16 %v240_v31, %v238_v30 }
  0x27   : > { %491 = vmatprep.subr.bf16.mxu0 %v381_v9  ;;  %v307_v37 = vld [vmem:[%s753_s27 + $0x308] sm:$0xff]  ;;  %v309_v38 = vld [vmem:[%s753_s27 + $0x318] sm:$0xff]  ;;  %v384_v40 = vpack.c.bf16 %v304_v34, %v302_v32  ;;  %v355_v41 = vpack.c.bf16 %v245_v36, %v243_v35  ;;  %v242_v42 = vld [vmem:[%s753_s27 + $0x100] sm:$0xff] }
  0x28   : > { %v244_v43 = vld [vmem:[%s753_s27 + $0x110] sm:$0xff]  ;;  %v306_v44 = vld [vmem:[%s753_s27 + $0x300] sm:$0xff]  ;;  %v387_v45 = vpack.c.bf16 %v309_v38, %v307_v37  ;;  %v247_v47 = vld [vmem:[%s753_s27 + $0x128] sm:$0xff] }
  0x29   : > { %449 = vmatpush1.bf16.msra.mxu1 %v348_v15  ;;  %v308_v46 = vld [vmem:[%s753_s27 + $0x310] sm:$0xff]  ;;  %v249_v48 = vld [vmem:[%s753_s27 + $0x138] sm:$0xff]  ;;  %v311_v49 = vld [vmem:[%s753_s27 + $0x328] sm:$0xff]  ;;  %v354_v51 = vpack.c.bf16 %v244_v43, %v242_v42 }
  0x2a   : > { %492 = vmatpush1.bf16.msra.mxu0 %v380_v16  ;;  %450 = vmatprep.subr.bf16.mxu1 %v351_v17  ;;  %v313_v50 = vld [vmem:[%s753_s27 + $0x338] sm:$0xff]  ;;  %v386_v52 = vpack.c.bf16 %v308_v46, %v306_v44  ;;  %v357_v53 = vpack.c.bf16 %v249_v48, %v247_v47  ;;  %v246_v54 = vld [vmem:[%s753_s27 + $0x120] sm:$0xff]  ;;  %v248_v55 = vld [vmem:[%s753_s27 + $0x130] sm:$0xff] }
  0x2b   : > { %493 = vmatprep.subr.bf16.mxu0 %v383_v21  ;;  %v310_v56 = vld [vmem:[%s753_s27 + $0x320] sm:$0xff]  ;;  %v389_v57 = vpack.c.bf16 %v313_v50, %v311_v49  ;;  %v312_v58 = vld [vmem:[%s753_s27 + $0x330] sm:$0xff]  ;;  %v251_v59 = vld [vmem:[%s753_s27 + $0x148] sm:$0xff]  ;;  %v356_v63 = vpack.c.bf16 %v248_v55, %v246_v54 }
  0x2c   : > { %v253_v60 = vld [vmem:[%s753_s27 + $0x158] sm:$0xff]  ;;  %v315_v61 = vld [vmem:[%s753_s27 + $0x348] sm:$0xff]  ;;  %v388_v0 = vpack.c.bf16 %v312_v58, %v310_v56  ;;  %v250_v2 = vld [vmem:[%s753_s27 + $0x140] sm:$0xff] }
  0x2d   : > { %451 = vmatpush1.bf16.msra.mxu1 %v350_v27  ;;  %v317_v62 = vld [vmem:[%s753_s27 + $0x358] sm:$0xff]  ;;  %v359_v1 = vpack.c.bf16 %v253_v60, %v251_v59  ;;  %v252_v3 = vld [vmem:[%s753_s27 + $0x150] sm:$0xff]  ;;  %v314_v4 = vld [vmem:[%s753_s27 + $0x340] sm:$0xff] }
  0x2e   : > { %494 = vmatpush1.bf16.msra.mxu0 %v382_v28  ;;  %452 = vmatprep.subr.bf16.mxu1 %v353_v29  ;;  %v391_v5 = vpack.c.bf16 %v317_v62, %v315_v61  ;;  %v316_v6 = vld [vmem:[%s753_s27 + $0x350] sm:$0xff]  ;;  %v255_v7 = vld [vmem:[%s753_s27 + $0x168] sm:$0xff]  ;;  %v257_v8 = vld [vmem:[%s753_s27 + $0x178] sm:$0xff]  ;;  %v358_v11 = vpack.c.bf16 %v252_v3, %v250_v2 }
  0x2f   : > { %495 = vmatprep.subr.bf16.mxu0 %v385_v33  ;;  %v319_v9 = vld [vmem:[%s753_s27 + $0x368] sm:$0xff]  ;;  %v321_v10 = vld [vmem:[%s753_s27 + $0x378] sm:$0xff]  ;;  %v390_v12 = vpack.c.bf16 %v316_v6, %v314_v4  ;;  %v361_v13 = vpack.c.bf16 %v257_v8, %v255_v7  ;;  %v254_v14 = vld [vmem:[%s753_s27 + $0x160] sm:$0xff] }
  0x30   : > { %v256_v15 = vld [vmem:[%s753_s27 + $0x170] sm:$0xff]  ;;  %v318_v16 = vld [vmem:[%s753_s27 + $0x360] sm:$0xff]  ;;  %v393_v17 = vpack.c.bf16 %v321_v10, %v319_v9  ;;  %v259_v19 = vld [vmem:[%s753_s27 + $0x188] sm:$0xff] }
  0x31   : > { %453 = vmatpush1.bf16.msra.mxu1 %v352_v39  ;;  %v320_v18 = vld [vmem:[%s753_s27 + $0x370] sm:$0xff]  ;;  %v261_v20 = vld [vmem:[%s753_s27 + $0x198] sm:$0xff]  ;;  %v323_v21 = vld [vmem:[%s753_s27 + $0x388] sm:$0xff]  ;;  %v360_v23 = vpack.c.bf16 %v256_v15, %v254_v14 }
  0x32   : > { %496 = vmatpush1.bf16.msra.mxu0 %v384_v40  ;;  %454 = vmatprep.subr.bf16.mxu1 %v355_v41  ;;  %v325_v22 = vld [vmem:[%s753_s27 + $0x398] sm:$0xff]  ;;  %v392_v24 = vpack.c.bf16 %v320_v18, %v318_v16  ;;  %v363_v25 = vpack.c.bf16 %v261_v20, %v259_v19  ;;  %v258_v26 = vld [vmem:[%s753_s27 + $0x180] sm:$0xff]  ;;  %v260_v27 = vld [vmem:[%s753_s27 + $0x190] sm:$0xff] }
  0x33   : > { %497 = vmatprep.subr.bf16.mxu0 %v387_v45  ;;  %v322_v28 = vld [vmem:[%s753_s27 + $0x380] sm:$0xff]  ;;  %v395_v29 = vpack.c.bf16 %v325_v22, %v323_v21  ;;  %v324_v30 = vld [vmem:[%s753_s27 + $0x390] sm:$0xff]  ;;  %v263_v31 = vld [vmem:[%s753_s27 + $0x1a8] sm:$0xff]  ;;  %v362_v35 = vpack.c.bf16 %v260_v27, %v258_v26 }
  0x34   : > { %v265_v32 = vld [vmem:[%s753_s27 + $0x1b8] sm:$0xff]  ;;  %v327_v33 = vld [vmem:[%s753_s27 + $0x3a8] sm:$0xff]  ;;  %v394_v36 = vpack.c.bf16 %v324_v30, %v322_v28  ;;  %v262_v38 = vld [vmem:[%s753_s27 + $0x1a0] sm:$0xff] }
  0x35   : > { %455 = vmatpush1.bf16.msra.mxu1 %v354_v51  ;;  %v329_v34 = vld [vmem:[%s753_s27 + $0x3b8] sm:$0xff]  ;;  %v365_v37 = vpack.c.bf16 %v265_v32, %v263_v31  ;;  %v264_v39 = vld [vmem:[%s753_s27 + $0x1b0] sm:$0xff]  ;;  %v326_v40 = vld [vmem:[%s753_s27 + $0x3a0] sm:$0xff] }
  0x36   : > { %498 = vmatpush1.bf16.msra.mxu0 %v386_v52  ;;  %456 = vmatprep.subr.bf16.mxu1 %v357_v53  ;;  %v397_v41 = vpack.c.bf16 %v329_v34, %v327_v33  ;;  %v328_v42 = vld [vmem:[%s753_s27 + $0x3b0] sm:$0xff]  ;;  %v267_v43 = vld [vmem:[%s753_s27 + $0x1c8] sm:$0xff]  ;;  %v269_v44 = vld [vmem:[%s753_s27 + $0x1d8] sm:$0xff]  ;;  %v364_v47 = vpack.c.bf16 %v264_v39, %v262_v38 }
  0x37   : > { %499 = vmatprep.subr.bf16.mxu0 %v389_v57  ;;  %v331_v45 = vld [vmem:[%s753_s27 + $0x3c8] sm:$0xff]  ;;  %v333_v46 = vld [vmem:[%s753_s27 + $0x3d8] sm:$0xff]  ;;  %v396_v48 = vpack.c.bf16 %v328_v42, %v326_v40  ;;  %v367_v49 = vpack.c.bf16 %v269_v44, %v267_v43  ;;  %v266_v50 = vld [vmem:[%s753_s27 + $0x1c0] sm:$0xff] }
  0x38   : > { %v268_v51 = vld [vmem:[%s753_s27 + $0x1d0] sm:$0xff]  ;;  %v330_v52 = vld [vmem:[%s753_s27 + $0x3c0] sm:$0xff]  ;;  %v399_v53 = vpack.c.bf16 %v333_v46, %v331_v45  ;;  %v271_v55 = vld [vmem:[%s753_s27 + $0x1e8] sm:$0xff] }
  0x39   : > { %457 = vmatpush1.bf16.msra.mxu1 %v356_v63  ;;  %v332_v54 = vld [vmem:[%s753_s27 + $0x3d0] sm:$0xff]  ;;  %v273_v56 = vld [vmem:[%s753_s27 + $0x1f8] sm:$0xff]  ;;  %v335_v57 = vld [vmem:[%s753_s27 + $0x3e8] sm:$0xff]  ;;  %v366_v59 = vpack.c.bf16 %v268_v51, %v266_v50 }
  0x3a   : > { %500 = vmatpush1.bf16.msra.mxu0 %v388_v0  ;;  %458 = vmatprep.subr.bf16.mxu1 %v359_v1  ;;  %v337_v58 = vld [vmem:[%s753_s27 + $0x3f8] sm:$0xff]  ;;  %v398_v60 = vpack.c.bf16 %v332_v54, %v330_v52  ;;  %v369_v61 = vpack.c.bf16 %v273_v56, %v271_v55  ;;  %v270_v62 = vld [vmem:[%s753_s27 + $0x1e0] sm:$0xff]  ;;  %v272_v63 = vld [vmem:[%s753_s27 + $0x1f0] sm:$0xff] }
  0x3b   : > { %501 = vmatprep.subr.bf16.mxu0 %v391_v5  ;;  %v401_v0 = vpack.c.bf16 %v337_v58, %v335_v57  ;;  %v334_v1 = vld [vmem:[%s753_s27 + $0x3e0] sm:$0xff]  ;;  %v336_v2 = vld [vmem:[%s753_s27 + $0x3f0] sm:$0xff]  ;;  %v368_v3 = vpack.c.bf16 %v272_v63, %v270_v62  ;;  %v669_v6 = vld [vmem:[%s903_s1 + $0x8] ss:$16 sps:$4 sm:$0xff]  }
  0x3c   : > { %v400_v4 = vpack.c.bf16 %v336_v2, %v334_v1  ;;  %v666_v5 = vld [vmem:[%s903_s1] ss:$16 sps:$4 sm:$0xff]  }
  0x3d   : > { %459 = vmatpush1.bf16.msra.mxu1 %v358_v11 }
  0x3e   : > { %502 = vmatpush1.bf16.msra.mxu0 %v390_v12  ;;  %460 = vmatprep.subr.bf16.mxu1 %v361_v13 }
  0x3f   : > { %503 = vmatprep.subr.bf16.mxu0 %v393_v17 }
  0x41   : > { %461 = vmatpush1.bf16.msra.mxu1 %v360_v23 }
  0x42   : > { %504 = vmatpush1.bf16.msra.mxu0 %v392_v24  ;;  %462 = vmatprep.subr.bf16.mxu1 %v363_v25 }
  0x43   : > { %505 = vmatprep.subr.bf16.mxu0 %v395_v29 }
  0x45   : > { %463 = vmatpush1.bf16.msra.mxu1 %v362_v35 }
  0x46   : > { %506 = vmatpush1.bf16.msra.mxu0 %v394_v36  ;;  %464 = vmatprep.subr.bf16.mxu1 %v365_v37 }
  0x47   : > { %507 = vmatprep.subr.bf16.mxu0 %v397_v41 }
  0x49   : > { %465 = vmatpush1.bf16.msra.mxu1 %v364_v47 }
  0x4a   : > { %508 = vmatpush1.bf16.msra.mxu0 %v396_v48  ;;  %466 = vmatprep.subr.bf16.mxu1 %v367_v49 }
  0x4b   : > { %509 = vmatprep.subr.bf16.mxu0 %v399_v53 }
  0x4d   : > { %467 = vmatpush1.bf16.msra.mxu1 %v366_v59 }
  0x4e   : > { %510 = vmatpush1.bf16.msra.mxu0 %v398_v60  ;;  %468 = vmatprep.subr.bf16.mxu1 %v369_v61 }
  0x4f   : > { %511 = vmatprep.subr.bf16.mxu0 %v401_v0 }
  0x51   : > { %469 = vmatpush1.bf16.msra.mxu1 %v368_v3 }
  0x52   : > { %512 = vmatpush1.bf16.msra.mxu0 %v400_v4 }
  0x54   : > { %471 = vmatmul.mubr.bf16.vlgmr.msra.gmra.mrb[0].mxu1 %v666_v5 }
  0x55   : > { %514 = vmatmul.mubr.bf16.vlgmr.msra.gmra.mrb[0].mxu0 %v669_v6 }
  0x87   : > { %v411_v7 = vpop.permute.xlu0 %410 }
  0x8b   : > { %v416_v8 = vpop.permute.xlu0 %415 }
 0x127   : > { %v472_v9 = vpop.f32.mrb[0].mxu1 }
 0x128   : > { %v473_v10 = vadd.f32 %v472_v9, %v411_v7  ;;  %v515_v11 = vpop.f32.mrb[0].mxu0  ;;  %v474_v12 = vpop.f32.mrb[1].mxu1 }
 0x129   : > { %v475_v13 = vadd.f32 %v474_v12, %v411_v7  ;;  %v517_v14 = vpop.f32.mrb[1].mxu0  ;;  %v476_v15 = vpop.f32.mrb[2].mxu1 }
 0x12a   : > { %v516_v16 = vadd.f32 %v515_v11, %v473_v10  ;;  %v477_v17 = vadd.f32 %v476_v15, %v416_v8  ;;  %v519_v18 = vpop.f32.mrb[2].mxu0  ;;  %v478_v19 = vpop.f32.mrb[3].mxu1 }
 0x12b   : > { %v518_v20 = vadd.f32 %v517_v14, %v475_v13  ;;  %v479_v21 = vadd.f32 %v478_v19, %v416_v8  ;;  %v521_v22 = vpop.f32.mrb[3].mxu0 }
 0x12c   : > { %524 = vst [vmem:[%s208_s8] sm:$0xff] %v516_v16  ;;  %v520_v23 = vadd.f32 %v519_v18, %v477_v17 }
 0x12d   : > { %525 = vst [vmem:[%s208_s8 + $0x8] sm:$0xff] %v518_v20  ;;  %v522_v24 = vadd.f32 %v521_v22, %v479_v21 }
 0x12e   : > { %526 = vst [vmem:[%s208_s8 + $0x10] sm:$0xff] %v520_v23 }
 0x12f   : > { %527 = vst [vmem:[%s208_s8 + $0x18] sm:$0xff] %v522_v24 }
 0x130 PF: > { %s13_s14 = sadd.s32 1, %s694_s14   ;;  %s906_s12 = smov %s690_s13 }
 0x131   : > { %p10_p5 = scmp.ge.s32.totalorder %s13_s14, 4   ;;  %s907_s13 = smov %s909_s15 }
 0x133   :  { %12 = sbr.rel (!%p10_p5) target bundleno = 2 (0x2), region = 62 }

</bundles_post_ra>
